<compile_context>
chip_gen: v7x
topology: tpu7x:2x2x1
jax: 0.10.0
libtpu: 0.0.40
codegen_flags: <defaults>
</compile_context>

<pallas_src>
import jax
import jax.numpy as jnp
from jax.experimental import pallas as pl
from jax.experimental.pallas import tpu as pltpu


def _round_up(x, m):
    return -(-x // m) * m


def _self_attention_kernel(hm_ref, a_ref, brow_ref, bias_ref, o_ref):
    # hm_ref:   (bt*L, D)  h rows for bt sequences, native dtype (f32 or bf16)
    # a_ref:    (D, Da)    same dtype as hm
    # brow_ref: (1, Da)    f32  (b as a row vector)
    # bias_ref: (bt*L, 1)  f32  additive mask bias, row-major
    # o_ref:    (bt, D)    pooled output, h's dtype
    rows, d = hm_ref.shape
    bt = o_ref.shape[0]
    seq = rows // bt

    hm = hm_ref[...]

    # e = tanh(h @ a) @ b : one tall MXU matmul (f32 accumulate), then the
    # length-Da projection with b as a VPU broadcast-multiply + lane reduction.
    ha = jnp.dot(hm, a_ref[...], preferred_element_type=jnp.float32)        # (rows, Da)
    t = jnp.tanh(ha)                                                         # f32 (EUP)
    e = jnp.sum(t * brow_ref[...], axis=-1, keepdims=True) + bias_ref[...]   # (rows, 1)

    # Row-major softmax over L: per-sequence (sublane-group) max/sum reductions,
    # no lane<->sublane relayout.
    e3 = e.reshape(bt, seq, 1)
    m = jnp.max(e3, axis=1, keepdims=True)                                   # (bt, 1, 1)
    p = jnp.exp(e3 - m)
    s = jnp.sum(p, axis=1, keepdims=True)                                    # (bt, 1, 1)
    attn = (p * pl.reciprocal(s, approx=True)).reshape(rows, 1)              # (rows, 1) f32

    # pooled = sum_L attn * h  (multiply promotes h to f32, f32 accumulation).
    weighted = attn * hm                                                     # (rows, D) f32
    pooled = jnp.sum(weighted.reshape(bt, seq, d), axis=1)                   # (bt, D) f32
    o_ref[...] = pooled.astype(o_ref.dtype)


def _vmem_capacity_bytes():
    try:
        info = pltpu.get_tpu_info()
        for name in ("vmem_capacity_bytes", "vmem_bytes", "vmem_size_bytes"):
            cap = getattr(info, name, None)
            if cap:
                return int(cap)
    except Exception:
        pass
    return 64 << 20     # conservative fallback: v7x per-TensorCore VMEM


def _step_footprint_bytes(bt, L, D, Da, in_bytes, out_bytes):
    """Conservative per-grid-step VMEM bytes: double-buffered blocks plus the
    in-kernel f32 temporaries, with lane(128)/sublane(8) padding applied."""
    lane = 128
    rows = _round_up(bt * L, 8)
    d_pad = _round_up(D, lane)
    da_pad = _round_up(Da, lane)
    h_blk = rows * d_pad * in_bytes
    bias_blk = rows * lane * 4                        # (rows, 1) f32 pads to 128 lanes
    out_blk = _round_up(bt, 8) * d_pad * out_bytes
    temps = (2 * rows * da_pad * 4                    # h@a and tanh temporaries
             + rows * d_pad * 4                       # weighted rows (f32)
             + 4 * rows * lane * 4)                   # e / p / attn scratch
    return 2 * (h_blk + bias_blk + out_blk) + temps


def self_attention_seq(h, a, b, mask=None, *, block_batch=None):
    """h: (B, L, D), mask: (B, L) bool (True = padding). Returns pooled (B, D) in h.dtype."""
    B, L, D = h.shape
    Da = a.shape[1]
    in_bytes = jnp.dtype(h.dtype).itemsize
    out_bytes = in_bytes

    # Additive mask bias (tiny, host-side), row-major (B*L, 1).
    if mask is None:
        bias = jnp.zeros((B * L, 1), jnp.float32)
    else:
        mask_f = mask.astype(jnp.float32)                                  # 1.0 = padding
        batch_mask = (jnp.sum(1.0 - mask_f, axis=-1, keepdims=True) > 0.0
                      ).astype(jnp.float32)                                # (B, 1)
        bias = ((-1e30) * mask_f * batch_mask).reshape(B * L, 1)

    hm = h.reshape(B * L, D)                     # free reshape, native dtype (no HBM pass)
    a_c = a.astype(h.dtype)                      # tiny (D, Da)
    brow = b.reshape(1, Da).astype(jnp.float32)

    # Generation-aware VMEM budget.
    cap = _vmem_capacity_bytes()
    vmem_limit = (96 << 20) if cap >= (100 << 20) else min(40 << 20, int(cap * 5 // 8))
    budget = int(vmem_limit * 0.7)

    # Sequences per grid step (bt): multiple of 8 (sublane-legal blocks) unless a
    # single full-array block is used; sized to the VMEM budget; no h padding.
    if block_batch is not None:
        bt = max(1, int(block_batch))
    elif _step_footprint_bytes(B, L, D, Da, in_bytes, out_bytes) <= budget:
        bt = B
    else:
        bt = 8
        bt_cap = _round_up(B, 8)
        while 2 * bt < bt_cap and _step_footprint_bytes(
                2 * bt, L, D, Da, in_bytes, out_bytes) <= budget:
            bt *= 2
    if bt >= B:
        bt = B                                   # single block: shapes equal full dims
    else:
        bt = _round_up(bt, 8)
        if bt >= B:
            bt = B
    grid = (pl.cdiv(B, bt),)

    return pl.pallas_call(
        _self_attention_kernel,
        out_shape=jax.ShapeDtypeStruct((B, D), h.dtype),
        grid_spec=pltpu.PrefetchScalarGridSpec(
            num_scalar_prefetch=0,
            grid=grid,
            in_specs=[
                pl.BlockSpec((bt * L, D), lambda i: (i, 0)),               # h rows
                pl.BlockSpec((D, Da), lambda i: (0, 0)),                   # a (invariant)
                pl.BlockSpec((1, Da), lambda i: (0, 0)),                   # b row (invariant)
                pl.BlockSpec((bt * L, 1), lambda i: (i, 0)),               # mask bias
            ],
            out_specs=pl.BlockSpec((bt, D), lambda i: (i, 0)),             # pooled, h dtype
        ),
        compiler_params=pltpu.CompilerParams(
            dimension_semantics=("parallel",),       # batch axis: v7x uses both TCs
            vmem_limit_bytes=vmem_limit,
        ),
    )(hm, a_c, brow, bias)


def _xavier_uniform(key, shape, gain):
    fan_in, fan_out = shape
    bound = gain * jnp.sqrt(6.0 / (fan_in + fan_out))
    return jax.random.uniform(key, shape, jnp.float32, -bound, bound)


def _reference(h, a, b, mask):
    e = jnp.matmul(jnp.tanh(jnp.matmul(h, a)), b)                          # (B, L, 1)
    if mask is not None:
        full_mask = -1e30 * mask.astype(jnp.float32)                       # (B, L)
        batch_mask = (jnp.sum(~mask, -1) > 0).astype(jnp.float32)[:, None]
        e = e + (full_mask * batch_mask)[..., None]
    attn = jax.nn.softmax(e, axis=1)                                       # (B, L, 1)
    return jnp.matmul(jnp.swapaxes(attn, 1, 2), h)[:, 0, :]                # (B, D)


if __name__ == "__main__":
    B, L, dim, da = 19, 8, 32, 16
    key = jax.random.PRNGKey(0)
    k_h, k_a, k_b = jax.random.split(key, 3)

    h = jax.random.normal(k_h, (B, L, dim), jnp.float32)
    a = _xavier_uniform(k_a, (dim, da), gain=1.414)
    b = _xavier_uniform(k_b, (da, 1), gain=1.414)

    # padding mask: True = padding.  Batch 1 has 3 padded tokens; batch 2 is fully
    # padded (exercises the batch_mask edge case from the PyTorch module).
    mask = jnp.zeros((B, L), bool).at[1, L - 3:].set(True).at[2, :].set(True)

    ref = _reference(h, a, b, mask)

    # Multi-block path: bt=8 -> grid of 3 with a ragged last block (B=19, no padding).
    out = self_attention_seq(h, a, b, mask, block_batch=8)
    jax.block_until_ready(out)
    assert out.shape == (B, dim)
    assert out.dtype == h.dtype
    assert jnp.allclose(out, ref, atol=1e-2, rtol=1e-2), float(jnp.max(jnp.abs(out - ref)))

    # Default (auto block size -> single full-array block) path, mask=None.
    out2 = self_attention_seq(h, a, b, None)
    jax.block_until_ready(out2)
    ref2 = _reference(h, a, b, None)
    assert jnp.allclose(out2, ref2, atol=1e-2, rtol=1e-2), float(jnp.max(jnp.abs(out2 - ref2)))

    # bf16 h stays bf16 end-to-end (no host-side dtype-conversion pass over h).
    h16 = h.astype(jnp.bfloat16)
    out3 = self_attention_seq(h16, a, b, mask)
    jax.block_until_ready(out3)
    assert out3.dtype == jnp.bfloat16
    ref3 = _reference(h16.astype(jnp.float32),
                      a.astype(jnp.bfloat16).astype(jnp.float32), b, mask)
    assert jnp.allclose(out3.astype(jnp.float32), ref3, atol=4e-2, rtol=4e-2), \
        float(jnp.max(jnp.abs(out3.astype(jnp.float32) - ref3)))

    print("KERNEL_OK")
</pallas_src>

<mosaic_0001>
module attributes {stable_mosaic.version = 11 : i64} {
  func.func @_self_attention_kernel(%arg0: i32, %arg1: memref<64x32xf32, #tpu.memory_space<vmem>>, %arg2: memref<32x16xf32, #tpu.memory_space<vmem>>, %arg3: memref<1x16xf32, #tpu.memory_space<vmem>>, %arg4: memref<64x1xf32, #tpu.memory_space<vmem>>, %arg5: memref<8x32xf32, #tpu.memory_space<vmem>>) attributes {dimension_semantics = [#tpu.dimension_semantics<parallel>], iteration_bounds = array<i64: 3>, scalar_prefetch = 0 : i64, scratch_operands = 0 : i64, tpu.core_type = #tpu.core_type<tc>, window_params = [{transform_indices = @transform_0, window_bounds = array<i64: 64, 32>}, {pipeline_mode = #tpu.pipeline_mode<synchronous>, transform_indices = @transform_1, window_bounds = array<i64: 32, 16>}, {pipeline_mode = #tpu.pipeline_mode<synchronous>, transform_indices = @transform_2, window_bounds = array<i64: 1, 16>}, {transform_indices = @transform_3, window_bounds = array<i64: 64, 1>}, {transform_indices = @transform_4, window_bounds = array<i64: 8, 32>}]} {
    %c0 = arith.constant 0 : index
    %c0_0 = arith.constant 0 : index
    %0 = vector.load %arg1[%c0, %c0_0] : memref<64x32xf32, #tpu.memory_space<vmem>>, vector<64x32xf32>
    %c0_1 = arith.constant 0 : index
    %c0_2 = arith.constant 0 : index
    %1 = vector.load %arg2[%c0_1, %c0_2] : memref<32x16xf32, #tpu.memory_space<vmem>>, vector<32x16xf32>
    %cst = arith.constant dense<0.000000e+00> : vector<64x16xf32>
    %2 = tpu.matmul %0, %1, %cst {dimension_numbers = #tpu.dot_dimension_numbers<[1], [0], [0], [1], [0, 0, 1, 1], [], []>} : vector<64x32xf32>, vector<32x16xf32>, vector<64x16xf32> -> vector<64x16xf32>
    %3 = math.tanh %2 : vector<64x16xf32>
    %c0_3 = arith.constant 0 : index
    %c0_4 = arith.constant 0 : index
    %4 = vector.load %arg3[%c0_3, %c0_4] : memref<1x16xf32, #tpu.memory_space<vmem>>, vector<1x16xf32>
    %5 = vector.broadcast %4 : vector<1x16xf32> to vector<64x16xf32>
    %6 = arith.mulf %3, %5 : vector<64x16xf32>
    %cst_5 = arith.constant dense<0.000000e+00> : vector<64xf32>
    %7 = vector.multi_reduction <add>, %6, %cst_5 [1] : vector<64x16xf32> to vector<64xf32>
    %8 = vector.shape_cast %7 : vector<64xf32> to vector<64x1xf32>
    %c0_6 = arith.constant 0 : index
    %c0_7 = arith.constant 0 : index
    %9 = vector.load %arg4[%c0_6, %c0_7] : memref<64x1xf32, #tpu.memory_space<vmem>>, vector<64x1xf32>
    %10 = arith.addf %8, %9 : vector<64x1xf32>
    %11 = vector.shape_cast %10 : vector<64x1xf32> to vector<8x8x1xf32>
    %cst_8 = arith.constant dense<0xFF800000> : vector<8x1xf32>
    %12 = vector.multi_reduction <maximumf>, %11, %cst_8 [1] : vector<8x8x1xf32> to vector<8x1xf32>
    %13 = vector.shape_cast %12 : vector<8x1xf32> to vector<8x1x1xf32>
    %14 = vector.broadcast %13 : vector<8x1x1xf32> to vector<8x8x1xf32>
    %15 = arith.subf %11, %14 : vector<8x8x1xf32>
    %16 = math.exp %15 : vector<8x8x1xf32>
    %cst_9 = arith.constant dense<0.000000e+00> : vector<8x1xf32>
    %17 = vector.multi_reduction <add>, %16, %cst_9 [1] : vector<8x8x1xf32> to vector<8x1xf32>
    %18 = vector.shape_cast %17 : vector<8x1xf32> to vector<8x1x1xf32>
    %19 = tpu.reciprocal %18 {approx = true} : vector<8x1x1xf32> -> vector<8x1x1xf32>
    %20 = vector.broadcast %19 : vector<8x1x1xf32> to vector<8x8x1xf32>
    %21 = arith.mulf %16, %20 : vector<8x8x1xf32>
    %22 = vector.shape_cast %21 : vector<8x8x1xf32> to vector<64x1xf32>
    %23 = vector.broadcast %22 : vector<64x1xf32> to vector<64x32xf32>
    %24 = arith.mulf %23, %0 : vector<64x32xf32>
    %25 = vector.shape_cast %24 : vector<64x32xf32> to vector<8x8x32xf32>
    %cst_10 = arith.constant dense<0.000000e+00> : vector<8x32xf32>
    %26 = vector.multi_reduction <add>, %25, %cst_10 [1] : vector<8x8x32xf32> to vector<8x32xf32>
    %c0_11 = arith.constant 0 : index
    %c0_12 = arith.constant 0 : index
    %27 = vector.load %arg5[%c0_11, %c0_12] : memref<8x32xf32, #tpu.memory_space<vmem>>, vector<8x32xf32>
    tpu.vector_store %arg5[%c0_11, %c0_12], %26 {strides = array<i32>} : memref<8x32xf32, #tpu.memory_space<vmem>>, vector<8x32xf32>,
    return
  }
  func.func @transform_0(%arg0: i32) -> (i32, i32) {
    %c0_i32 = arith.constant 0 : i32
    %c0_i32_0 = arith.constant 0 : i32
    return %arg0, %c0_i32 : i32, i32
  }
  func.func @transform_1(%arg0: i32) -> (i32, i32) {
    %c0_i32 = arith.constant 0 : i32
    %c0_i32_0 = arith.constant 0 : i32
    %c0_i32_1 = arith.constant 0 : i32
    return %c0_i32, %c0_i32_0 : i32, i32
  }
  func.func @transform_2(%arg0: i32) -> (i32, i32) {
    %c0_i32 = arith.constant 0 : i32
    %c0_i32_0 = arith.constant 0 : i32
    %c0_i32_1 = arith.constant 0 : i32
    return %c0_i32, %c0_i32_0 : i32, i32
  }
  func.func @transform_3(%arg0: i32) -> (i32, i32) {
    %c0_i32 = arith.constant 0 : i32
    %c0_i32_0 = arith.constant 0 : i32
    return %arg0, %c0_i32 : i32, i32
  }
  func.func @transform_4(%arg0: i32) -> (i32, i32) {
    %c0_i32 = arith.constant 0 : i32
    %c0_i32_0 = arith.constant 0 : i32
    return %arg0, %c0_i32 : i32, i32
  }
}

</mosaic_0001>

<bundles_post_ra>
// kernel: tpu_custom_call.1
= control target key start
LH: loop header
LB: loop body
LE: loop exit
PB: predicated region body
PF: predicated region fallthrough
CT: control target
= control target key end

     0   :  { %9 = vsyncpa [#allocation3], 0  ;;  %s1323_s0 = inlined_call_operand.vmem [shape: f32[152,32], index: 0, kind: input, shape index: {}]   ;;  %s1324_s1 = inlined_call_operand.vmem [shape: f32[32,16], index: 1, kind: input, shape index: {}]   ;;  %s1325_s2 = inlined_call_operand.vmem [shape: f32[1,16], index: 2, kind: input, shape index: {}]   ;;  %s1326_s3 = inlined_call_operand.vmem [shape: f32[152,1], index: 3, kind: input, shape index: {}]   ;;  %s1327_s4 = inlined_call_operand.hbm [shape: f32[19,32], index: 4, kind: output, shape index: {}]  }
   0x1   :  { %11 = vsyncpa [#allocation3 + $0x1], 0  ;;  %s1079_s15 = smov 0   ;;  %s1081_s16 = smov 0  }
   0x2   :  { %s1083_s17 = smov 0   ;;  %s1085_s18 = smov 0  }
   0x3 LB: > { %s1100_s19 = sadd.s32 4294967295, %s1050_s18   ;;  %s832_s20 = sadd.s32 4294967294, %s1050_s18   ;;  %s1050_s18 = sphi %s1085_s18, %s1333_s18   ;;  %s1046_s17 = sphi %s1083_s17, %s1332_s17   ;;  %s1042_s16 = sphi %s1081_s16, %s1331_s16   ;;  %s1038_s15 = sphi %s1079_s15, %s1330_s15  }
   0x4   : > { %s1104_s21 = sadd.s32 1, %s1050_s18   ;;  %s118_s22 = sadd.s32 1, %s1046_s17 }
   0x5   : > { %s115_s23 = ssub.s32 %s1050_s18, %s1104_s21  ;;  %p128_p0 = scmp.ne.s32.totalorder %s1046_s17, %s1042_s16 }
   0x6   : > { %p116_p1 = scmp.eq.s32.totalorder %s115_s23, 0  ;;  %p129_p2 = scmp.eq.s32.totalorder %s1100_s19, 2 }
   0x7   : > { %p134_p3 = scmp.ne.s32.totalorder %s1042_s16, %s1038_s15  ;;  %p135_p4 = scmp.eq.s32.totalorder %s832_s20, 2 }
   0x8   : > { %s1115_s24 = scalar_select %p116_p1, %s1046_s17, %s118_s22  }
   0x9   : > { %p1117_p5 = por %p129_p2, %p128_p0  ;;  %p1121_p6 = por %p135_p4, %p134_p3 }
   0xa   : > { %p835_p7 = scmp.ge.s32.totalorder %s1050_s18, 1  ;;  %p193_p8 = scmp.lt.s32.totalorder %s1050_s18, 4 }
   0xc   : > { %p194_p9 = pnand %p835_p7, %p193_p8 }
   0xd   : > { %v268_v0 = vld [vmem:[%s1324_s1] sm:$0xff] (!%p194_p9)  ;;  %v269_v1 = vld [vmem:[%s1324_s1 + $0x8] sm:$0xff] (!%p194_p9)  ;;  %v270_v2 = vld [vmem:[%s1324_s1 + $0x10] sm:$0xff] (!%p194_p9)  ;;  %s837_s7 = sshll.u32 (!%p194_p9), %s1100_s19, 3  ;;  %vm272_vm0 = vcmask (!%p194_p9), 261120   ;;  %vm425_vm1 = vcmask (!%p194_p9), 130048  }
   0xe   : > { %197 = sbr.rel (%p194_p9) target bundleno = 642 (0x282), region = 36  ;;  %v886_v3 = vpack.c.bf16 (!%p194_p9), %v269_v1, %v268_v0  ;;  %v271_v4 = vld [vmem:[%s1324_s1 + $0x18] sm:$0xff] (!%p194_p9)  ;;  %p237_p10 = scmp.lt.s32.totalorder (!%p194_p9), %s837_s7, 18  ;;  %v849_v22 = vld [vmem:[%s1325_s2] ss:$0 sm:$0xff] (!%p194_p9)  ;;  %v1052_v47 = vmov (!%p194_p9), 0  }
   0xf   : > { %v890_v5 = vpack.c.bf16 (!%p194_p9), %v271_v4, %v270_v2  ;;  %939 = vset.pattern.permute.xlu1 (!%p194_p9), %v1052_v47  ;;  %938 = vset.pattern.permute.xlu0 (!%p194_p9), %v1052_v47  ;;  %vm466_vm2 = vcmask (!%p194_p9), 7168   ;;  %vm731_vm3 = vcmask (!%p194_p9), 1041409   ;;  %s229_s28 = sand.u32 (!%p194_p9), 1, %s1042_s16   ;;  %vm733_vm4 = vcmask (!%p194_p9), 1042434   ;;  %s851_s30 = sshll.u32 (!%p194_p9), %s1100_s19, 7 }
  0x10   : > { %887 = vmatprep.subr.bf16.mxu0 (!%p194_p9), %v886_v3  ;;  %894 = vmatprep.subr.bf16.mxu1 (!%p194_p9), %v886_v3  ;;  %vm735_vm5 = vcmask (!%p194_p9), 1043459   ;;  %s836_s29 = sshll.u32 (!%p194_p9), %s229_s28, 3  ;;  %vm737_vm6 = vcmask (!%p194_p9), 1044484   ;;  %vm739_vm7 = vcmask (!%p194_p9), 1045509   ;;  %vm741_vm8 = vcmask (!%p194_p9), 1046534   ;;  %s1278_s9 = scalar_lea.hbm (!%p194_p9), %s1327_s4, %s851_s30 }
  0x11   : > { %889 = vmatpush3.bf16.msra.mxu0 (!%p194_p9), %v886_v3  ;;  %896 = vmatpush3.bf16.msra.mxu1 (!%p194_p9), %v886_v3  ;;  %s231_s5 = scalar_lea.vmem (!%p194_p9), [#allocation2], %s836_s29  ;;  %vm743_vm9 = vcmask (!%p194_p9), 1047559   ;;  %s748_s19 = scalar_lea.sflag (!%p194_p9), [#allocation3], %s229_s28 }
  0x12   : > { %891 = vmatprep.subr.bf16.mxu0 (!%p194_p9), %v890_v5  ;;  %895 = vmatprep.subr.bf16.mxu1 (!%p194_p9), %v890_v5  ;;  %s761_s6 = sshll.u32 (!%p194_p9), %s231_s5, 4  ;;  %s1053_s11 = smov (!%p194_p9), [#allocation2]   ;;  %s1280_s6 = int_to_ptr.vmem [resolvable:$true] %s761_s6 }
  0x13   : > { %s992_s12 = sshll.u32 (!%p194_p9), %s1053_s11, 4  ;;  %s993_s12 = int_to_ptr.vmem [resolvable:$false] %s992_s12 }
  0x14   : > { %p995_p0 = scmp.lt.s32.totalorder (!%p194_p9), %s1280_s6, %s993_s12 }
  0x15   : > { %s1335_s7 = smov (!%p237_p10, %s837_s7), 18  ;;  %893 = vmatpush3.bf16.msra.mxu0 %v890_v5  ;;  %897 = vmatpush3.bf16.msra.mxu1 %v890_v5 }
  0x16   : > { %s838_s10 = sshll.u32 %s1335_s7, 3 }
  0x17   : > { %s240_s13 = scalar_lea.vmem %s1323_s0, %s838_s10  ;;  %s1196_s27 = scalar_lea.vmem %s1326_s3, %s838_s10 }
  0x18   : > { %v1148_v6 = vld [vmem:[%s240_s13] sm:$0xff]  ;;  %v1152_v7 = vld [vmem:[%s240_s13 + $0x8] sm:$0xff]  ;;  %v1156_v9 = vld [vmem:[%s240_s13 + $0x10] sm:$0xff]  ;;  %s988_s10 = scalar_lea.vmem %s1280_s6, 128 }
  0x19   : > { %874 = vmatprep.mubr.msk.f32.mxu0 %vm272_vm0, %v1148_v6  ;;  %v1154_v8 = vld [vmem:[%s240_s13 + $0x20] sm:$0xff]  ;;  %v1160_v10 = vld [vmem:[%s240_s13 + $0x28] sm:$0xff]  ;;  %v1162_v11 = vld [vmem:[%s240_s13 + $0x30] sm:$0xff]  ;;  %p989_p11 = scmp.ne.s32.totalorder %s1280_s6, %s988_s10 }
  0x1a   : > { %880 = vmatprep.mubr.msk.f32.mxu1 %vm272_vm0, %v1154_v8  ;;  %875 = vmatmul.mubr.msk.f32.vlgmr.msra.gmra.mrb[0].mxu0 %vm272_vm0, %v1152_v7  ;;  %v1168_v12 = vld [vmem:[%s240_s13 + $0x18] sm:$0xff]  ;;  %v451_v48 = vld [vmem:[%s1196_s27 + $0x8] sm:$0xff]  ;;  %v450_v51 = vld [vmem:[%s1196_s27] sm:$0xff] }
  0x1b   : > { %877 = vmatprep.mubr.msk.f32.mxu0 %vm272_vm0, %v1156_v9  ;;  %881 = vmatmul.mubr.msk.f32.vlgmr.msra.gmra.mrb[0].mxu1 %vm272_vm0, %v1160_v10  ;;  %v1174_v13 = vld [vmem:[%s240_s13 + $0x38] sm:$0xff]  ;;  %v454_v60 = vld [vmem:[%s1196_s27 + $0x20] sm:$0xff]  ;;  %v452_v61 = vld [vmem:[%s1196_s27 + $0x10] sm:$0xff]  ;;  %p990_p12 = pnand %p989_p11, %p1117_p5  ;;  %s994_s13 = scalar_lea.vmem %s993_s12, 256 }
  0x1c   : > { %883 = vmatprep.mubr.msk.f32.mxu1 %vm272_vm0, %v1162_v11  ;;  %v453_v52 = vld [vmem:[%s1196_s27 + $0x18] sm:$0xff]  ;;  %p996_p1 = scmp.lt.s32.totalorder %s994_s13, %s988_s10 }
  0x1d   : > { %p991_p13 = pneg %p990_p12 }
  0x1e   : > { %878 = vmatmul.mubr.msk.f32.gmra.mrb[2].mxu0 %vm272_vm0, %v1168_v12  ;;  %p997_p2 = por %p996_p1, %p995_p0 }
  0x1f   : > { %884 = vmatmul.mubr.msk.f32.gmra.mrb[2].mxu1 %vm272_vm0, %v1174_v13 }
  0x20   : > { %p998_p3 = pnand %p997_p2, %p991_p13 }
  0xed   : > { %v876_v14 = vpop.f32.mrb[0].mxu0 }
  0xee   : > { %940 = vtanh.f32 %v876_v14  ;;  %v363_v15 = vpop.f32.mrb[1].mxu0  ;;  %v882_v16 = vpop.f32.mrb[0].mxu1 }
  0xef   : > { %942 = vtanh.f32 %v363_v15  ;;  %v383_v17 = vpop.f32.mrb[1].mxu1 }
  0xf0   : > { %944 = vtanh.f32 %v383_v17 }
  0xf1   : > { %v879_v18 = vpop.f32.mrb[2].mxu0 }
  0xf2   : > { %946 = vtanh.f32 %v879_v18  ;;  %v373_v19 = vpop.f32.mrb[3].mxu0  ;;  %v885_v20 = vpop.f32.mrb[2].mxu1  ;;  %v456_v18 = vld [vmem:[%s1196_s27 + $0x30] sm:$0xff] }
  0xf3   : > { %948 = vtanh.f32 %v373_v19  ;;  %v393_v21 = vpop.f32.mrb[3].mxu1  ;;  %v455_v19 = vld [vmem:[%s1196_s27 + $0x28] sm:$0xff] }
  0xf4   : > { %950 = vtanh.f32 %v882_v16 }
  0xf5   : > { %952 = vtanh.f32 %v393_v21 }
  0xf6   : > { %954 = vtanh.f32 %v885_v20 }
  0xf8   : > { %v941_v23 = vpop.eup %940 }
  0xf9   : > { %v943_v24 = vpop.eup %942  ;;  %v418_v25 = vmul.f32 %v941_v23, %v849_v22 }
  0xfa   : > { %v945_v26 = vpop.eup %944  ;;  %v417_v28 = vmul.f32 %v943_v24, %v849_v22 }
  0xfb   : > { %v429_v27 = vsel %vm425_vm1, %v418_v25, 0.0  ;;  %v421_v32 = vmul.f32 %v945_v26, %v849_v22 }
  0xfc   : > { %v947_v29 = vpop.eup %946  ;;  %430 = vadd.xlane.f32.xlu0 %v429_v27  ;;  %v426_v35 = vsel %vm425_vm1, %v417_v28, 0.0 }
  0xfd   : > { %v949_v30 = vpop.eup %948  ;;  %v420_v31 = vmul.f32 %v947_v29, %v849_v22  ;;  %v438_v38 = vsel %vm425_vm1, %v421_v32, 0.0 }
  0xfe   : > { %v951_v33 = vpop.eup %950  ;;  %v419_v37 = vmul.f32 %v949_v30, %v849_v22 }
  0xff   : > { %v953_v34 = vpop.eup %952  ;;  %v435_v36 = vsel %vm425_vm1, %v420_v31, 0.0  ;;  %v422_v40 = vmul.f32 %v951_v33, %v849_v22 }
 0x100   : > { %427 = vadd.xlane.f32.xlu0 %v426_v35  ;;  %436 = vadd.xlane.f32.xlu1 %v435_v36  ;;  %v423_v39 = vmul.f32 %v953_v34, %v849_v22  ;;  %v955_v41 = vpop.eup %954  ;;  %v432_v42 = vsel %vm425_vm1, %v419_v37, 0.0  ;;  %v457_v35 = vld [vmem:[%s1196_s27 + $0x38] sm:$0xff] }
 0x101   : > { %v441_v44 = vsel %vm425_vm1, %v422_v40, 0.0  ;;  %v424_v45 = vmul.f32 %v955_v41, %v849_v22 }
 0x102   : > { %v444_v43 = vsel %vm425_vm1, %v423_v39, 0.0 }
 0x103   : > { %v447_v46 = vsel %vm425_vm1, %v424_v45, 0.0 }
 0x104   : > { %439 = vadd.xlane.f32.xlu0 %v438_v38  ;;  %433 = vadd.xlane.f32.xlu1 %v432_v42 }
 0x108   : > { %445 = vadd.xlane.f32.xlu0 %v444_v43  ;;  %442 = vadd.xlane.f32.xlu1 %v441_v44 }
 0x10c   : > { %448 = vadd.xlane.f32.xlu1 %v447_v46 }
 0x189   : > { %v431_v49 = vpop.xlane.xlu0 %430 }
 0x18a   : > { %v459_v50 = vadd.f32 %v451_v48, %v431_v49 }
 0x18c   : > { %v474_v53 = vsel %vm466_vm2, %v459_v50, -inf }
 0x18d   : > { %v475_v54 = vrot.slane %v474_v53, 4  ;;  %v428_v55 = vpop.xlane.xlu0 %427  ;;  %v437_v56 = vpop.xlane.xlu1 %436 }
 0x18e   : > { %v1202_v57 = vadd.f32 %v450_v51, %v428_v55  ;;  %v1204_v58 = vadd.f32 %v453_v52, %v437_v56 }
 0x18f   : > { %v476_v59 = vmax.f32 %v474_v53, %v475_v54 }
 0x190   : > { %v467_v62 = vsel %vm466_vm2, %v1202_v57, -inf  ;;  %v488_v63 = vsel %vm466_vm2, %v1204_v58, -inf }
 0x191   : > { %v477_v0 = vrot.slane %v476_v59, 2  ;;  %v468_v1 = vrot.slane %v467_v62, 4  ;;  %v489_v2 = vrot.slane %v488_v63, 4  ;;  %v440_v3 = vpop.xlane.xlu0 %439  ;;  %v434_v4 = vpop.xlane.xlu1 %433 }
 0x192   : > { %v1212_v5 = vadd.f32 %v454_v60, %v440_v3  ;;  %v1214_v14 = vadd.f32 %v452_v61, %v434_v4 }
 0x193   : > { %v478_v15 = vmax.f32 %v476_v59, %v477_v0  ;;  %v469_v16 = vmax.f32 %v467_v62, %v468_v1  ;;  %v490_v17 = vmax.f32 %v488_v63, %v489_v2 }
 0x194   : > { %v495_v20 = vsel %vm466_vm2, %v1212_v5, -inf  ;;  %v481_v21 = vsel %vm466_vm2, %v1214_v14, -inf }
 0x195   : > { %v479_v22 = vrot.slane %v478_v15, 1  ;;  %v470_v23 = vrot.slane %v469_v16, 2  ;;  %v491_v24 = vrot.slane %v490_v17, 2  ;;  %v496_v25 = vrot.slane %v495_v20, 4  ;;  %v446_v26 = vpop.xlane.xlu0 %445  ;;  %v443_v27 = vpop.xlane.xlu1 %442 }
 0x196   : > { %v482_v28 = vrot.slane %v481_v21, 4  ;;  %v464_v29 = vadd.f32 %v456_v18, %v446_v26  ;;  %v463_v30 = vadd.f32 %v455_v19, %v443_v27 }
 0x197   : > { %v480_v31 = vmax.f32 %v478_v15, %v479_v22  ;;  %v471_v32 = vmax.f32 %v469_v16, %v470_v23  ;;  %v492_v33 = vmax.f32 %v490_v17, %v491_v24  ;;  %v497_v34 = vmax.f32 %v495_v20, %v496_v25 }
 0x198   : > { %v483_v36 = vmax.f32 %v481_v21, %v482_v28  ;;  %v509_v37 = vsel %vm466_vm2, %v464_v29, -inf  ;;  %v502_v38 = vsel %vm466_vm2, %v463_v30, -inf }
 0x199   : > { %v524_v39 = vsub.f32 %v459_v50, %v480_v31  ;;  %v472_v40 = vrot.slane %v471_v32, 1  ;;  %v493_v41 = vrot.slane %v492_v33, 1  ;;  %v498_v42 = vrot.slane %v497_v34, 2  ;;  %v449_v43 = vpop.xlane.xlu1 %448 }
 0x19a   : > { %v484_v44 = vrot.slane %v483_v36, 2  ;;  %v510_v45 = vrot.slane %v509_v37, 4  ;;  %v503_v46 = vrot.slane %v502_v38, 4  ;;  %v465_v47 = vadd.f32 %v457_v35, %v449_v43 }
 0x19b   : > { %v533_v48 = vmul.f32 1.442695, %v524_v39  ;;  %v473_v49 = vmax.f32 %v471_v32, %v472_v40  ;;  %v494_v51 = vmax.f32 %v492_v33, %v493_v41  ;;  %v499_v52 = vmax.f32 %v497_v34, %v498_v42 }
 0x19c   : > { %v485_v53 = vmax.f32 %v483_v36, %v484_v44  ;;  %v511_v54 = vmax.f32 %v509_v37, %v510_v45  ;;  %v504_v55 = vmax.f32 %v502_v38, %v503_v46  ;;  %v516_v56 = vsel %vm466_vm2, %v465_v47, -inf }
 0x19d   : > { %956 = vpow2.f32 %v533_v48  ;;  %v523_v50 = vsub.f32 %v1202_v57, %v473_v49  ;;  %v526_v59 = vsub.f32 %v1204_v58, %v494_v51  ;;  %v500_v60 = vrot.slane %v499_v52, 1 }
 0x19e   : > { %v486_v61 = vrot.slane %v485_v53, 1  ;;  %v512_v62 = vrot.slane %v511_v54, 2  ;;  %v505_v63 = vrot.slane %v504_v55, 2  ;;  %v517_v0 = vrot.slane %v516_v56, 4 }
 0x19f   : > { %v531_v1 = vmul.f32 1.442695, %v523_v50  ;;  %v537_v2 = vmul.f32 1.442695, %v526_v59  ;;  %v501_v3 = vmax.f32 %v499_v52, %v500_v60 }
 0x1a0   : > { %v487_v4 = vmax.f32 %v485_v53, %v486_v61  ;;  %v513_v15 = vmax.f32 %v511_v54, %v512_v62  ;;  %v506_v16 = vmax.f32 %v504_v55, %v505_v63  ;;  %v518_v17 = vmax.f32 %v516_v56, %v517_v0 }
 0x1a1   : > { %958 = vpow2.f32 %v531_v1  ;;  %v527_v18 = vsub.f32 %v1212_v5, %v501_v3 }
 0x1a2   : > { %960 = vpow2.f32 %v537_v2  ;;  %v525_v57 = vsub.f32 %v1214_v14, %v487_v4  ;;  %v514_v19 = vrot.slane %v513_v15, 1  ;;  %v507_v58 = vrot.slane %v506_v16, 1 }
 0x1a3   : > { %v539_v20 = vmul.f32 1.442695, %v527_v18  ;;  %v519_v21 = vrot.slane %v518_v17, 2 }
 0x1a4   : > { %v535_v22 = vmul.f32 1.442695, %v525_v57  ;;  %v515_v23 = vmax.f32 %v513_v15, %v514_v19  ;;  %v508_v24 = vmax.f32 %v506_v16, %v507_v58 }
 0x1a5   : > { %962 = vpow2.f32 %v539_v20  ;;  %v520_v25 = vmax.f32 %v518_v17, %v519_v21 }
 0x1a6   : > { %964 = vpow2.f32 %v535_v22  ;;  %v529_v26 = vsub.f32 %v464_v29, %v515_v23  ;;  %v528_v27 = vsub.f32 %v463_v30, %v508_v24 }
 0x1a7   : > { %v957_v28 = vpop.eup %956  ;;  %v521_v31 = vrot.slane %v520_v25, 1 }
 0x1a8   : > { %v554_v32 = vsel %vm466_vm2, %v957_v28, 0.0  ;;  %v543_v5 = vmul.f32 1.442695, %v529_v26  ;;  %v541_v33 = vmul.f32 1.442695, %v528_v27 }
 0x1a9   : > { %v555_v34 = vrot.slane %v554_v32, 4  ;;  %v522_v14 = vmax.f32 %v520_v25, %v521_v31 }
 0x1aa   : > { %966 = vpow2.f32 %v543_v5 }
 0x1ab   : > { %v959_v35 = vpop.eup %958  ;;  %v556_v36 = vadd.f32 %v555_v34, %v554_v32  ;;  %968 = vpow2.f32 %v541_v33  ;;  %v530_v37 = vsub.f32 %v465_v47, %v522_v14 }
 0x1ac   : > { %v1231_v38 = vpop.eup %960  ;;  %v547_v39 = vsel %vm466_vm2, %v959_v35, 0.0 }
 0x1ad   : > { %v557_v40 = vrot.slane %v556_v36, 2  ;;  %v548_v29 = vrot.slane %v547_v39, 4  ;;  %v568_v30 = vsel %vm466_vm2, %v1231_v38, 0.0  ;;  %v545_v41 = vmul.f32 1.442695, %v530_v37 }
 0x1ae   : > { %v569_v46 = vrot.slane %v568_v30, 4 }
 0x1af   : > { %v1236_v42 = vpop.eup %962  ;;  %v549_v43 = vadd.f32 %v548_v29, %v547_v39  ;;  %970 = vpow2.f32 %v545_v41  ;;  %v558_v44 = vadd.f32 %v557_v40, %v556_v36 }
 0x1b0   : > { %v1238_v45 = vpop.eup %964  ;;  %v575_v47 = vsel %vm466_vm2, %v1236_v42, 0.0  ;;  %v570_v50 = vadd.f32 %v569_v46, %v568_v30 }
 0x1b1   : > { %v550_v48 = vrot.slane %v549_v43, 2  ;;  %v576_v49 = vrot.slane %v575_v47, 4  ;;  %v561_v51 = vsel %vm466_vm2, %v1238_v45, 0.0  ;;  %v559_v52 = vrot.slane %v558_v44, 1 }
 0x1b2   : > { %v562_v59 = vrot.slane %v561_v51, 4  ;;  %v571_v3 = vrot.slane %v570_v50, 2 }
 0x1b3   : > { %v577_v53 = vadd.f32 %v576_v49, %v575_v47  ;;  %v560_v54 = vadd.f32 %v559_v52, %v558_v44  ;;  %v551_v55 = vadd.f32 %v550_v48, %v549_v43 }
 0x1b4   : > { %v1244_v56 = vpop.eup %966  ;;  %v563_v4 = vadd.f32 %v562_v59, %v561_v51  ;;  %v572_v20 = vadd.f32 %v571_v3, %v570_v50 }
 0x1b5   : > { %v969_v60 = vpop.eup %968  ;;  %v578_v61 = vrot.slane %v577_v53, 2  ;;  %972 = vrcp.f32 %v560_v54  ;;  %v552_v62 = vrot.slane %v551_v55, 1  ;;  %v589_v63 = vsel %vm466_vm2, %v1244_v56, 0.0 }
 0x1b6   : > { %v582_v0 = vsel %vm466_vm2, %v969_v60, 0.0  ;;  %v590_v16 = vrot.slane %v589_v63, 4  ;;  %v564_v58 = vrot.slane %v563_v4, 2  ;;  %v573_v31 = vrot.slane %v572_v20, 1 }
 0x1b7   : > { %v583_v1 = vrot.slane %v582_v0, 4  ;;  %v553_v2 = vadd.f32 %v552_v62, %v551_v55  ;;  %v579_v18 = vadd.f32 %v578_v61, %v577_v53 }
 0x1b8   : > { %v591_v21 = vadd.f32 %v590_v16, %v589_v63  ;;  %v565_v32 = vadd.f32 %v564_v58, %v563_v4  ;;  %v574_v39 = vadd.f32 %v573_v31, %v572_v20 }
 0x1b9   : > { %v971_v15 = vpop.eup %970  ;;  %v584_v17 = vadd.f32 %v583_v1, %v582_v0  ;;  %974 = vrcp.f32 %v553_v2  ;;  %v580_v24 = vrot.slane %v579_v18, 1 }
 0x1ba   : > { %v596_v57 = vsel %vm466_vm2, %v971_v15, 0.0  ;;  %v592_v5 = vrot.slane %v591_v21, 2  ;;  %v566_v29 = vrot.slane %v565_v32, 1 }
 0x1bb   : > { %v585_v19 = vrot.slane %v584_v17, 2  ;;  %v597_v22 = vrot.slane %v596_v57, 4  ;;  %v581_v14 = vadd.f32 %v580_v24, %v579_v18 }
 0x1bc   : > { %v593_v30 = vadd.f32 %v592_v5, %v591_v21  ;;  %v567_v41 = vadd.f32 %v566_v29, %v565_v32 }
 0x1bd   : > { %v586_v23 = vadd.f32 %v585_v19, %v584_v17  ;;  %v598_v33 = vadd.f32 %v597_v22, %v596_v57 }
 0x1be   : > { %v594_v43 = vrot.slane %v593_v30, 1 }
 0x1bf   : > { %v973_v25 = vpop.eup %972  ;;  %v587_v26 = vrot.slane %v586_v23, 1  ;;  %v599_v40 = vrot.slane %v598_v33, 2 }
 0x1c0   : > { %v612_v27 = vmul.f32 %v973_v25, %v957_v28  ;;  %v595_v46 = vadd.f32 %v594_v43, %v593_v30 }
 0x1c1   : > { %v588_v34 = vadd.f32 %v587_v26, %v586_v23  ;;  %v600_v28 = vadd.f32 %v599_v40, %v598_v33 }
 0x1c2   : > { %626 = vperm.xlu1 %939, %v612_v27  }
 0x1c3   : > { %v975_v36 = vpop.eup %974  ;;  %976 = vrcp.f32 %v588_v34  ;;  %v601_v47 = vrot.slane %v600_v28, 1 }
 0x1c4   : > { %v611_v37 = vmul.f32 %v975_v36, %v959_v35  ;;  %978 = vrcp.f32 %v581_v14 }
 0x1c5   : > { %980 = vrcp.f32 %v574_v39  ;;  %v602_v51 = vadd.f32 %v601_v47, %v600_v28 }
 0x1c6   : > { %621 = vperm.xlu0 %938, %v611_v37   ;;  %982 = vrcp.f32 %v567_v41 }
 0x1c7   : > { %984 = vrcp.f32 %v595_v46 }
 0x1c8   : > { %986 = vrcp.f32 %v602_v51 }
 0x1cd   : > { %v977_v44 = vpop.eup %976 }
 0x1ce   : > { %v616_v48 = vmul.f32 %v977_v44, %v969_v60  ;;  %v979_v49 = vpop.eup %978 }
 0x1cf   : > { %v615_v35 = vmul.f32 %v979_v49, %v1236_v42  ;;  %v981_v52 = vpop.eup %980 }
 0x1d0   : > { %646 = vperm.xlu1 %939, %v616_v48   ;;  %v614_v53 = vmul.f32 %v981_v52, %v1231_v38  ;;  %v983_v54 = vpop.eup %982 }
 0x1d1   : > { %v613_v55 = vmul.f32 %v983_v54, %v1238_v45  ;;  %v985_v50 = vpop.eup %984 }
 0x1d2   : > { %v617_v59 = vmul.f32 %v985_v50, %v1244_v56  ;;  %v987_v60 = vpop.eup %986 }
 0x1d3   : > { %v618_v61 = vmul.f32 %v987_v60, %v971_v15 }
 0x1d4   : > { %641 = vperm.xlu1 %939, %v615_v35  }
 0x1d8   : > { %636 = vperm.xlu1 %939, %v614_v53  }
 0x1dc   : > { %631 = vperm.xlu1 %939, %v613_v55  }
 0x1e0   : > { %651 = vperm.xlu1 %939, %v617_v59  }
 0x1e4   : > { %656 = vperm.xlu1 %939, %v618_v61  }
 0x241   : > { %v627_v63 = vpop.permute.xlu1 %626 }
 0x242   : > { %v660_v0 = vmul.f32 %v627_v63, %v1152_v7 }
 0x244   : > { %v674_v2 = vsel %vm272_vm0, %v660_v0, 0.0 }
 0x245   : > { %v622_v62 = vpop.permute.xlu0 %621  ;;  %v675_v56 = vrot.slane %v674_v2, 4 }
 0x246   : > { %v659_v42 = vmul.f32 %v622_v62, %v1148_v6 }
 0x247   : > { %v676_v7 = vadd.f32 %v675_v56, %v674_v2 }
 0x248   : > { %v667_v38 = vsel %vm272_vm0, %v659_v42, 0.0 }
 0x249   : > { %v668_v45 = vrot.slane %v667_v38, 4  ;;  %v677_v24 = vrot.slane %v676_v7, 2 }
 0x24b   : > { %v669_v15 = vadd.f32 %v668_v45, %v667_v38 }
 0x24d   : > { %v670_v20 = vrot.slane %v669_v15, 2 }
 0x24f   : > { %v647_v1 = vpop.permute.xlu1 %646  ;;  %v671_v27 = vadd.f32 %v670_v20, %v669_v15 }
 0x250   : > { %v664_v3 = vmul.f32 %v647_v1, %v1160_v10 }
 0x251   : > { %v672_v39 = vrot.slane %v671_v27, 1 }
 0x252   : > { %v702_v17 = vsel %vm272_vm0, %v664_v3, 0.0 }
 0x253   : > { %v642_v4 = vpop.permute.xlu1 %641  ;;  %v703_v58 = vrot.slane %v702_v17, 4 }
 0x254   : > { %v663_v16 = vmul.f32 %v642_v4, %v1154_v8 }
 0x255   : > { %v704_v25 = vadd.f32 %v703_v58, %v702_v17 }
 0x256   : > { %v695_v18 = vsel %vm272_vm0, %v663_v16, 0.0 }
 0x257   : > { %v696_v6 = vrot.slane %v695_v18, 4  ;;  %v637_v57 = vpop.permute.xlu1 %636  ;;  %v705_v36 = vrot.slane %v704_v25, 2 }
 0x258   : > { %v662_v19 = vmul.f32 %v637_v57, %v1168_v12  ;;  %v678_v12 = vadd.f32 %v677_v24, %v676_v7 }
 0x259   : > { %v697_v22 = vadd.f32 %v696_v6, %v695_v18  ;;  %v706_v46 = vadd.f32 %v705_v36, %v704_v25 }
 0x25a   : > { %v688_v21 = vsel %vm272_vm0, %v662_v19, 0.0  ;;  %v679_v28 = vrot.slane %v678_v12, 1 }
 0x25b   : > { %v689_v10 = vrot.slane %v688_v21, 4  ;;  %v632_v23 = vpop.permute.xlu1 %631  ;;  %v698_v32 = vrot.slane %v697_v22, 2  ;;  %v707_v50 = vrot.slane %v706_v46, 1 }
 0x25c   : > { %v661_v8 = vmul.f32 %v632_v23, %v1156_v9  ;;  %v680_v55 = vadd.f32 %v679_v28, %v678_v12 }
 0x25d   : > { %v690_v26 = vadd.f32 %v689_v10, %v688_v21  ;;  %v699_v9 = vadd.f32 %v698_v32, %v697_v22  ;;  %v708_v2 = vadd.f32 %v707_v50, %v706_v46 }
 0x25e   : > { %v681_v31 = vsel %vm272_vm0, %v661_v8, 0.0 }
 0x25f   : > { %v691_v5 = vrot.slane %v690_v26, 2  ;;  %v682_v33 = vrot.slane %v681_v31, 4  ;;  %v652_v34 = vpop.permute.xlu1 %651  ;;  %v700_v35 = vrot.slane %v699_v9, 1 }
 0x260   : > { %v665_v14 = vmul.f32 %v652_v34, %v1162_v11  ;;  %v673_v11 = vadd.f32 %v672_v39, %v671_v27 }
 0x261   : > { %v683_v37 = vadd.f32 %v682_v33, %v681_v31  ;;  %v692_v40 = vadd.f32 %v691_v5, %v690_v26  ;;  %v701_v63 = vadd.f32 %v700_v35, %v699_v9 }
 0x262   : > { %v709_v29 = vsel %vm272_vm0, %v665_v14, 0.0  ;;  %v732_v61 = vsel %vm731_vm3, %v680_v55, %v673_v11 }
 0x263   : > { %v684_v30 = vrot.slane %v683_v37, 2  ;;  %v710_v41 = vrot.slane %v709_v29, 4  ;;  %v657_v43 = vpop.permute.xlu1 %656  ;;  %v693_v49 = vrot.slane %v692_v40, 1 }
 0x264   : > { %v666_v44 = vmul.f32 %v657_v43, %v1174_v13 }
 0x265   : > { %v685_v47 = vadd.f32 %v684_v30, %v683_v37  ;;  %v711_v48 = vadd.f32 %v710_v41, %v709_v29  ;;  %v694_v62 = vadd.f32 %v693_v49, %v692_v40 }
 0x266   : > { %v716_v51 = vsel %vm272_vm0, %v666_v44, 0.0 }
 0x267   : > { %v686_v52 = vrot.slane %v685_v47, 1  ;;  %v712_v53 = vrot.slane %v711_v48, 2  ;;  %v717_v54 = vrot.slane %v716_v51, 4 }
 0x269   : > { %v687_v59 = vadd.f32 %v686_v52, %v685_v47  ;;  %v713_v13 = vadd.f32 %v712_v53, %v711_v48  ;;  %v718_v60 = vadd.f32 %v717_v54, %v716_v51 }
 0x26b   : > { %v734_v42 = vsel %vm733_vm4, %v687_v59, %v732_v61  ;;  %v714_v0 = vrot.slane %v713_v13, 1  ;;  %v719_v38 = vrot.slane %v718_v60, 2 }
 0x26c   : > { %v736_v1 = vsel %vm735_vm5, %v694_v62, %v734_v42 }
 0x26d   : > { %v720_v45 = vadd.f32 %v719_v38, %v718_v60  ;;  %v738_v3 = vsel %vm737_vm6, %v701_v63, %v736_v1  ;;  %v715_v4 = vadd.f32 %v714_v0, %v713_v13 }
 0x26e   : > { %v740_v16 = vsel %vm739_vm7, %v708_v2, %v738_v3 }
 0x26f   : > { %v721_v56 = vrot.slane %v720_v45, 1  ;;  %v742_v17 = vsel %vm741_vm8, %v715_v4, %v740_v16 }
 0x271   : > { %v722_v15 = vadd.f32 %v721_v56, %v720_v45 }
 0x273   : > { %v744_v18 = vsel %vm743_vm9, %v722_v15, %v742_v17 }
 0x274   : > { %746 = vst.msk [vmem:[%s231_s5] sm:$0xff] %vm272_vm0, %v744_v18 }
 0x275   : > { %1001 = shalt.err (!%p998_p3)
}
 0x276   : > { %s1002_s14 = scalar_lea.hbm %s1278_s9, 128  ;;  %s1006_s23 = scalar_lea.hbm %s1327_s4, 384 }
 0x277   : > { %p1003_p4 = scmp.ne.s32.totalorder %s1278_s9, %s1002_s14  ;;  %p1007_p9 = scmp.lt.u32.totalorder %s1278_s9, %s1327_s4 }
 0x278   : > { %p1008_p10 = scmp.lt.u32.totalorder %s1006_s23, %s1002_s14  ;;  %p1010_p12 = scmp.lt.u32.totalorder %s1002_s14, %s1278_s9 }
 0x279   : > { %p1004_p7 = pnand %p1003_p4, %p1117_p5 }
 0x27a   : > { %p1009_p11 = por %p1008_p10, %p1007_p9 }
 0x27b   : > { %p1005_p8 = pneg %p1004_p7 }
 0x27c   : > { %p1011_p13 = por %p1010_p12, %p1009_p11 }
 0x27e   : > { %p1012_p0 = pnand %p1011_p13, %p1005_p8 }
 0x280   : > { %1015 = shalt.err (!%p1012_p0)
}
 0x281   : > { %898 = dma.vmem_to_hbm [thread:$0]  (%p1117_p5), %s1280_s6, 128, %s1278_s9, %s748_s19  }
 0x282 PF: > { %p904_p1 = scmp.ge.s32.totalorder %s1050_s18, 2  ;;  %s773_s29 = sand.u32 1, %s1038_s15  }
 0x283   : > { %s774_s30 = scalar_lea.sflag [#allocation3], %s773_s29 }
 0x284   : > { %p901_p2 = pnand %p904_p1, %p1121_p6 }
 0x286   : > { %1033 = dma.done.wait (!%p901_p2), %s774_s30, 128  }
 0x287   : > { %1035 = vsyncadd (!%p901_p2), %s774_s30, 4294967168  ;;  %p14_p3 = scmp.ge.s32.totalorder %s1104_s21, 5   ;;  %s1330_s15 = smov %s1042_s16 }
 0x288   : > { %s1331_s16 = smov %s1046_s17  ;;  %s1332_s17 = smov %s1115_s24 }
 0x289   : > { %s1333_s18 = smov %s1104_s21  ;;  %16 = sbr.rel (!%p14_p3) target bundleno = 3 (0x3), region = 74 }
 0x290   :  { %779 = vsyncpa [#allocation3], 1 }
 0x291   :  { %781 = vsyncpa [#allocation3 + $0x1], 1 }

</bundles_post_ra>
